<compile_context>
chip_gen: v5e
topology: v5e:2x2
jax: 0.10.0
libtpu: 0.0.40
codegen_flags: <defaults>
</compile_context>

<pallas_src>
import jax
import jax.numpy as jnp
from jax.experimental import pallas as pl
from jax.experimental.pallas import tpu as pltpu

_LANE = 128              # lane width of a vreg
_SUBLANE = 8             # sublane count of a vreg
_TILE_M_DEFAULT = 1024   # rows per grid step: 3*1024*128*4 B = 1.5 MiB / array
_MIN_PALLAS_POINTS = 1024  # below this, plain XLA beats kernel launch overhead


def _round_up(v, m):
    return ((v + m - 1) // m) * m


def lorenz63_kernel(params_ref, state_ref, out_ref):
    # params_ref: SMEM (3,) f32            -> [sigma, rho, beta]
    # state_ref : VMEM (3, TILE_M, 128) f32
    # out_ref   : VMEM (3, TILE_M, 128) f32
    sigma = params_ref[0]
    rho = params_ref[1]
    beta = params_ref[2]

    x = state_ref[0]                      # (TILE_M, 128) dense slab
    y = state_ref[1]
    z = state_ref[2]

    out_ref[0] = sigma * (y - x)          # dx = sigma * (y - x)
    out_ref[1] = x * (rho - z) - y        # dy = x * (rho - z) - y
    out_ref[2] = x * y - beta * z         # dz = x * y - beta * z


def lorenz63_ref(params, state):
    sigma, rho, beta = params[0], params[1], params[2]
    x, y, z = state[0], state[1], state[2]
    dx = sigma * (y - x)
    dy = x * (rho - z) - y
    dz = x * y - beta * z
    return jnp.stack([dx, dy, dz])


def lorenz63_pallas(params, state, *, tile_m=_TILE_M_DEFAULT,
                    min_pallas_points=_MIN_PALLAS_POINTS):
    """params: (3,) = [sigma, rho, beta]; state: (3,) or (3, ...)."""
    orig_shape = state.shape
    orig_dtype = state.dtype
    assert orig_shape[0] == 3, "state must unpack into (x, y, z) along dim 0"

    state2d = state.reshape(3, -1)
    n = state2d.shape[1]
    params_f32 = params.astype(jnp.float32)

    # Small-state fast path: a pallas_call launch + two DMAs is microseconds
    # of overhead for 9*n flops — plain XLA wins here (covers the (3,) case).
    if n < min_pallas_points:
        out = lorenz63_ref(params_f32, state2d.astype(jnp.float32))
        return out.reshape(orig_shape).astype(orig_dtype)

    # Lane-dense layout: fold the batch into (M, 128) slabs. Pad only to the
    # sublane granule (multiple of 8 rows); partial row-tiles are handled by
    # the cdiv grid + Pallas masking, so no full-tile padding is needed.
    m = -(-n // _LANE)                    # ceil(n / 128)
    m_pad = _round_up(m, _SUBLANE)        # rows, multiple of 8
    n_pad = m_pad * _LANE

    x = state2d.astype(jnp.float32)
    if n_pad != n:
        x = jnp.pad(x, ((0, 0), (0, n_pad - n)))
    x3 = x.reshape(3, m_pad, _LANE)       # contiguous reshape: no copy

    tm = min(_round_up(tile_m, _SUBLANE), m_pad)   # rows per grid step
    grid = (pl.cdiv(m_pad, tm),)

    out3 = pl.pallas_call(
        lorenz63_kernel,
        out_shape=jax.ShapeDtypeStruct((3, m_pad, _LANE), jnp.float32),
        grid=grid,
        in_specs=[
            pl.BlockSpec(memory_space=pltpu.SMEM),             # scalar params
            pl.BlockSpec((3, tm, _LANE), lambda i: (0, i, 0)),  # state tile
        ],
        out_specs=pl.BlockSpec((3, tm, _LANE), lambda i: (0, i, 0)),
        compiler_params=pltpu.CompilerParams(
            dimension_semantics=("parallel",)),
        cost_estimate=pl.CostEstimate(
            flops=9 * n_pad, transcendentals=0, bytes_accessed=24 * n_pad),
    )(params_f32, x3)

    out = out3.reshape(3, n_pad)[:, :n]
    return out.reshape(orig_shape).astype(orig_dtype)


if __name__ == "__main__":
    # Deterministic parameter init (classic Lorenz-63 values).
    sigma, rho, beta = 10.0, 28.0, 8.0 / 3.0
    params = jnp.array([sigma, rho, beta], dtype=jnp.float32)
    key = jax.random.PRNGKey(0)
    t = jnp.float32(0.0)  # unused by the dynamics, matching the PyTorch API

    # 1) Small batched state, large enough to take the tiled Pallas path;
    #    non-multiple of 128 points to exercise the lane/sublane padding.
    state = jax.random.normal(key, (3, 16, 130), dtype=jnp.float32)
    out = jax.block_until_ready(lorenz63_pallas(params, state))
    ref = lorenz63_ref(params, state)
    assert out.shape == state.shape and out.dtype == state.dtype
    assert jnp.allclose(out, ref, atol=1e-5, rtol=1e-5)

    # 2) Same input with a tiny tile to exercise a multi-step grid
    #    (including a partial last row-block handled by Pallas masking).
    out_small_tile = jax.block_until_ready(
        lorenz63_pallas(params, state, tile_m=8))
    assert jnp.allclose(out_small_tile, ref, atol=1e-5, rtol=1e-5)

    # 3) Canonical (3,)-vector ODE state: handled by the small-N XLA fallback.
    state_vec = jnp.array([1.0, 1.0, 1.0], dtype=jnp.float32)
    out_vec = jax.block_until_ready(lorenz63_pallas(params, state_vec))
    assert out_vec.shape == state_vec.shape
    assert jnp.allclose(out_vec, lorenz63_ref(params, state_vec), atol=1e-5)

    print("KERNEL_OK")
</pallas_src>

<mosaic_0001>
module attributes {stable_mosaic.version = 11 : i64} {
  func.func @lorenz63_kernel(%arg0: i32, %arg1: memref<3xf32, #tpu.memory_space<smem>>, %arg2: memref<3x24x128xf32, #tpu.memory_space<vmem>>, %arg3: memref<3x24x128xf32, #tpu.memory_space<vmem>>) attributes {dimension_semantics = [#tpu.dimension_semantics<parallel>], iteration_bounds = array<i64: 1>, scalar_prefetch = 0 : i64, scratch_operands = 0 : i64, tpu.core_type = #tpu.core_type<tc>, window_params = [{transform_indices = @transform_0, window_bounds = array<i64: 3>}, {transform_indices = @transform_1, window_bounds = array<i64: 3, 24, 128>}, {transform_indices = @transform_2, window_bounds = array<i64: 3, 24, 128>}]} {
    %c0 = arith.constant 0 : index
    %0 = memref.load %arg1[%c0] : memref<3xf32, #tpu.memory_space<smem>>
    %c1 = arith.constant 1 : index
    %1 = memref.load %arg1[%c1] : memref<3xf32, #tpu.memory_space<smem>>
    %c2 = arith.constant 2 : index
    %2 = memref.load %arg1[%c2] : memref<3xf32, #tpu.memory_space<smem>>
    %c0_0 = arith.constant 0 : index
    %c0_1 = arith.constant 0 : index
    %c0_2 = arith.constant 0 : index
    %3 = vector.load %arg2[%c0_0, %c0_1, %c0_2] : memref<3x24x128xf32, #tpu.memory_space<vmem>>, vector<1x24x128xf32>
    %4 = vector.shape_cast %3 : vector<1x24x128xf32> to vector<24x128xf32>
    %c1_3 = arith.constant 1 : index
    %c0_4 = arith.constant 0 : index
    %c0_5 = arith.constant 0 : index
    %5 = vector.load %arg2[%c1_3, %c0_4, %c0_5] : memref<3x24x128xf32, #tpu.memory_space<vmem>>, vector<1x24x128xf32>
    %6 = vector.shape_cast %5 : vector<1x24x128xf32> to vector<24x128xf32>
    %c2_6 = arith.constant 2 : index
    %c0_7 = arith.constant 0 : index
    %c0_8 = arith.constant 0 : index
    %7 = vector.load %arg2[%c2_6, %c0_7, %c0_8] : memref<3x24x128xf32, #tpu.memory_space<vmem>>, vector<1x24x128xf32>
    %8 = vector.shape_cast %7 : vector<1x24x128xf32> to vector<24x128xf32>
    %9 = arith.subf %6, %4 : vector<24x128xf32>
    %10 = vector.broadcast %0 : f32 to vector<24x128xf32>
    %11 = arith.mulf %10, %9 : vector<24x128xf32>
    %c0_9 = arith.constant 0 : index
    %c0_10 = arith.constant 0 : index
    %c0_11 = arith.constant 0 : index
    %12 = vector.load %arg3[%c0_9, %c0_10, %c0_11] : memref<3x24x128xf32, #tpu.memory_space<vmem>>, vector<1x24x128xf32>
    %13 = vector.shape_cast %12 : vector<1x24x128xf32> to vector<24x128xf32>
    %14 = vector.shape_cast %11 : vector<24x128xf32> to vector<1x24x128xf32>
    tpu.vector_store %arg3[%c0_9, %c0_10, %c0_11], %14 {strides = array<i32>} : memref<3x24x128xf32, #tpu.memory_space<vmem>>, vector<1x24x128xf32>,
    %15 = vector.broadcast %1 : f32 to vector<24x128xf32>
    %16 = arith.subf %15, %8 : vector<24x128xf32>
    %17 = arith.mulf %4, %16 : vector<24x128xf32>
    %18 = arith.subf %17, %6 : vector<24x128xf32>
    %c1_12 = arith.constant 1 : index
    %c0_13 = arith.constant 0 : index
    %c0_14 = arith.constant 0 : index
    %19 = vector.load %arg3[%c1_12, %c0_13, %c0_14] : memref<3x24x128xf32, #tpu.memory_space<vmem>>, vector<1x24x128xf32>
    %20 = vector.shape_cast %19 : vector<1x24x128xf32> to vector<24x128xf32>
    %21 = vector.shape_cast %18 : vector<24x128xf32> to vector<1x24x128xf32>
    tpu.vector_store %arg3[%c1_12, %c0_13, %c0_14], %21 {strides = array<i32>} : memref<3x24x128xf32, #tpu.memory_space<vmem>>, vector<1x24x128xf32>,
    %22 = arith.mulf %4, %6 : vector<24x128xf32>
    %23 = vector.broadcast %2 : f32 to vector<24x128xf32>
    %24 = arith.mulf %23, %8 : vector<24x128xf32>
    %25 = arith.subf %22, %24 : vector<24x128xf32>
    %c2_15 = arith.constant 2 : index
    %c0_16 = arith.constant 0 : index
    %c0_17 = arith.constant 0 : index
    %26 = vector.load %arg3[%c2_15, %c0_16, %c0_17] : memref<3x24x128xf32, #tpu.memory_space<vmem>>, vector<1x24x128xf32>
    %27 = vector.shape_cast %26 : vector<1x24x128xf32> to vector<24x128xf32>
    %28 = vector.shape_cast %25 : vector<24x128xf32> to vector<1x24x128xf32>
    tpu.vector_store %arg3[%c2_15, %c0_16, %c0_17], %28 {strides = array<i32>} : memref<3x24x128xf32, #tpu.memory_space<vmem>>, vector<1x24x128xf32>,
    return
  }
  func.func @transform_0(%arg0: i32) -> i32 {
    %c0_i32 = arith.constant 0 : i32
    %c0_i32_0 = arith.constant 0 : i32
    return %c0_i32 : i32
  }
  func.func @transform_1(%arg0: i32) -> (i32, i32, i32) {
    %c0_i32 = arith.constant 0 : i32
    %c0_i32_0 = arith.constant 0 : i32
    %c0_i32_1 = arith.constant 0 : i32
    return %c0_i32, %arg0, %c0_i32_0 : i32, i32, i32
  }
  func.func @transform_2(%arg0: i32) -> (i32, i32, i32) {
    %c0_i32 = arith.constant 0 : i32
    %c0_i32_0 = arith.constant 0 : i32
    %c0_i32_1 = arith.constant 0 : i32
    return %c0_i32, %arg0, %c0_i32_0 : i32, i32, i32
  }
}

</mosaic_0001>

<bundles_post_ra>
// kernel: tpu_custom_call.1
= control target key start
LH: loop header
LB: loop body
LE: loop exit
PB: predicated region body
PF: predicated region fallthrough
CT: control target
= control target key end

     0   :  { %7 = vsyncpa [#allocation5], 0  ;;  %s221_s0 = inlined_call_operand.hbm [shape: f32[3], index: 0, kind: input, shape index: {}]   ;;  %s222_s1 = inlined_call_operand.hbm [shape: f32[3,24,128], index: 1, kind: input, shape index: {}]   ;;  %s223_s2 = inlined_call_operand.hbm [shape: f32[3,24,128], index: 2, kind: output, shape index: {}]  }
   0x1   :  { %8 = vsyncpa [#allocation3], 0 }
   0x2   :  { %9 = vsyncpa [#allocation4], 0  ;;  %s15_s11 = sshll.u32 %s221_s0, 4  ;;  %s23_s14 = sshll.u32 %s222_s1, 4  ;;  %s16_s11 = int_to_ptr.hbm [resolvable:$true] %s15_s11  ;;  %s24_s14 = int_to_ptr.hbm [resolvable:$true] %s23_s14 }
   0x3   :  { %s186_s15 = smov [#allocation2]   ;;  %s187_s16 = smov [#allocation6]  }
   0x4   :  { %18 = dma.hbm_to_smem %s16_s11, 16, %s186_s15, [#allocation5]  }
   0x5   :  { %s25_s17 = sshll.u32 %s187_s16, 4  ;;  %s188_s18 = smov 128   ;;  %s26_s17 = int_to_ptr.vmem [resolvable:$true] %s25_s17 }
   0x6   :  { %s189_s19 = smov 8  }
   0x7   :  { %31 = dma.hbm_to_vmem [thread:$0]  %s24_s14, 1152, %s26_s17, [#allocation3], %s188_s18, %s188_s18, %s189_s19  }
   0x8   :  { %180 = dma.done.wait [#allocation5], 16  }
   0x9   :  { %181 = vsyncadd [#allocation5], 4294967280 }
   0xa   :  { %182 = dma.done.wait [#allocation3], 1152  }
   0xb   :  { %183 = vsyncadd [#allocation3], 4294966144 }
   0xc   :  { %40 = sfence }
   0xd   :  { %s41_s0 = sld [smem:[#allocation2]]  ;;  %v44_v0 = vld [vmem:[#allocation6] sm:$0xff]  ;;  %v48_v1 = vld [vmem:[#allocation6 + $0x18] sm:$0xff]  ;;  %v45_v2 = vld [vmem:[#allocation6 + $0x8] sm:$0xff]  ;;  %s190_s21 = smov [#allocation7]  }
   0xe   :  { %v49_v3 = vld [vmem:[#allocation6 + $0x20] sm:$0xff]  ;;  %v46_v4 = vld [vmem:[#allocation6 + $0x10] sm:$0xff]  ;;  %v50_v5 = vld [vmem:[#allocation6 + $0x28] sm:$0xff]  ;;  %s113_s1 = sld [smem:[#allocation2 + $0x1]]  ;;  %v55_v6 = vsub.f32 %v48_v1, %v44_v0  ;;  %v79_v13 = vmul.f32 %v48_v1, %v44_v0  ;;  %s97_s22 = sshll.u32 %s190_s21, 4  ;;  %s98_s22 = int_to_ptr.vmem [resolvable:$true] %s97_s22 }
   0xf   :  { %s114_s20 = sld [smem:[#allocation2 + $0x2]]  ;;  %v56_v7 = vsub.f32 %v49_v3, %v45_v2  ;;  %v57_v8 = vsub.f32 %v50_v5, %v46_v4  ;;  %v52_v9 = vld [vmem:[#allocation6 + $0x30] sm:$0xff]  ;;  %v53_v10 = vld [vmem:[#allocation6 + $0x38] sm:$0xff]  ;;  %v54_v11 = vld [vmem:[#allocation6 + $0x40] sm:$0xff]  ;;  %v80_v23 = vmul.f32 %v49_v3, %v45_v2  ;;  %v81_v25 = vmul.f32 %v50_v5, %v46_v4  ;;  %s99_s25 = sshll.u32 %s223_s2, 4  ;;  %s100_s25 = int_to_ptr.hbm [resolvable:$true] %s99_s25 }
  0x13   :  { %v58_v12 = vstv %s41_s0 }
  0x14   :  { %v59_v14 = vmul.f32 %v58_v12, %v55_v6  ;;  %v60_v15 = vmul.f32 %v58_v12, %v56_v7  ;;  %v61_v16 = vmul.f32 %v58_v12, %v57_v8  ;;  %v65_v17 = vstv %s113_s1 }
  0x15   :  { %v66_v18 = vsub.f32 %v65_v17, %v52_v9  ;;  %v67_v19 = vsub.f32 %v65_v17, %v53_v10  ;;  %v68_v20 = vsub.f32 %v65_v17, %v54_v11  ;;  %v82_v21 = vstv %s114_s20 }
  0x16   :  { %62 = vst [vmem:[#allocation7] sm:$0xff] %v59_v14  ;;  %v83_v22 = vmul.f32 %v82_v21, %v52_v9  ;;  %v84_v24 = vmul.f32 %v82_v21, %v53_v10  ;;  %v85_v29 = vmul.f32 %v82_v21, %v54_v11 }
  0x17   :  { %63 = vst [vmem:[#allocation7 + $0x8] sm:$0xff] %v60_v15  ;;  %v69_v26 = vmul.f32 %v66_v18, %v44_v0  ;;  %v70_v27 = vmul.f32 %v67_v19, %v45_v2  ;;  %v71_v28 = vmul.f32 %v68_v20, %v46_v4 }
  0x18   :  { %64 = vst [vmem:[#allocation7 + $0x10] sm:$0xff] %v61_v16  ;;  %v86_v30 = vsub.f32 %v79_v13, %v83_v22  ;;  %v87_v34 = vsub.f32 %v80_v23, %v84_v24  ;;  %v88_v35 = vsub.f32 %v81_v25, %v85_v29 }
  0x19   :  { %v72_v31 = vsub.f32 %v69_v26, %v48_v1  ;;  %v73_v32 = vsub.f32 %v70_v27, %v49_v3  ;;  %v74_v33 = vsub.f32 %v71_v28, %v50_v5 }
  0x1a   :  { %90 = vst [vmem:[#allocation7 + $0x30] sm:$0xff] %v86_v30 }
  0x1b   :  { %76 = vst [vmem:[#allocation7 + $0x18] sm:$0xff] %v72_v31 }
  0x1c   :  { %77 = vst [vmem:[#allocation7 + $0x20] sm:$0xff] %v73_v32 }
  0x1d   :  { %78 = vst [vmem:[#allocation7 + $0x28] sm:$0xff] %v74_v33 }
  0x1e   :  { %91 = vst [vmem:[#allocation7 + $0x38] sm:$0xff] %v87_v34 }
  0x1f   :  { %92 = vst [vmem:[#allocation7 + $0x40] sm:$0xff] %v88_v35 }
  0x20   :  { %105 = dma.vmem_to_hbm [thread:$0]  %s98_s22, 1152, %s100_s25, [#allocation4], %s188_s18, %s188_s18, %s189_s19  }
  0x21   :  { %184 = dma.done.wait [#allocation4], 1152  }
  0x22   :  { %185 = vsyncadd [#allocation4], 4294966144 }
  0x23   :  { %110 = vsyncpa [#allocation3], 1 }
  0x24   :  { %111 = vsyncpa [#allocation4], 1 }
  0x25   :  { %112 = vsyncpa [#allocation5], 1 }

</bundles_post_ra>
